<compile_context>
chip_gen: v7x
topology: tpu7x:2x2x1
jax: 0.10.0
libtpu: 0.0.40
codegen_flags: <defaults>
</compile_context>

<pallas_src>
import functools

import jax
import jax.numpy as jnp
import numpy as np
from jax.experimental import pallas as pl
from jax.experimental.pallas import tpu as pltpu


def _cost_volume_kernel(l_ref, r_ref, o_ref, *scratch, tile_d, direction,
                        single_chunk):
    """One (batch, H-tile, disparity-chunk) grid step.

    l_ref, r_ref : (1, C, TH, W) VMEM blocks of the left / right features.
    o_ref        : (1, 1, TD, TH, W) VMEM block of the cost volume.
    scratch      : optional (C, TH, W) VMEM buffer holding R pre-rotated by the
                   chunk base shift (only when there is more than one chunk).
    """
    C = l_ref.shape[1]
    W = l_ref.shape[3]

    if single_chunk:
        # Single disparity chunk: chunk base shift is statically zero, read R
        # straight from its (resident) input block.
        def r_channel(c):
            return r_ref[0, c]
    else:
        rot_ref = scratch[0]
        dk = pl.program_id(2)
        chunk_step = (tile_d * direction) % W       # static, non-negative

        @pl.when(dk == 0)
        def _seed():
            # New (b, h) tile: seed the rotation scratch with the unshifted block.
            rot_ref[...] = r_ref[0]

        if chunk_step:
            @pl.when(dk != 0)
            def _advance():
                # Advance the base rotation by TD disparities (static XLU roll),
                # channel by channel so only one tile is live at a time.
                for c in range(C):
                    rot_ref[c] = pltpu.roll(rot_ref[c], shift=chunk_step, axis=1)

        def r_channel(c):
            return rot_ref[c]

    # Static disparity loop (TD small) with a fully unrolled channel loop.
    # Per (j, c): two tile loads + one in-register XLU roll fused into the f32
    # MAC; no rotated tensor is ever written back to VMEM.
    for j in range(tile_d):
        sj = (j * direction) % W                    # static in-chunk shift
        acc = None
        for c in range(C):
            rc = r_channel(c)
            if sj:
                rc = pltpu.roll(rc, shift=sj, axis=1)
            prod = l_ref[0, c].astype(jnp.float32) * rc.astype(jnp.float32)
            acc = prod if acc is None else acc + prod
        o_ref[0, 0, j] = acc.astype(o_ref.dtype)


def _vmem_capacity_bytes(default=64 << 20):
    """Physical per-core VMEM (128 MiB on v5e/v6e, 64 MiB on v7x), with fallback."""
    try:
        info = pltpu.get_tpu_info()
        cap = getattr(info, "vmem_capacity_bytes", None)
        if cap:
            return int(cap)
    except Exception:
        pass
    return default


def _block_vmem_bytes(C, tile_h, W, tile_d, in_bytes, out_bytes, multi_chunk):
    use = 4 * C * tile_h * W * in_bytes             # L and R blocks, double-buffered
    use += 2 * tile_d * tile_h * W * out_bytes      # output block, double-buffered
    if multi_chunk:
        use += C * tile_h * W * in_bytes            # rotation scratch
    use += 4 * tile_h * W * 4                       # in-kernel f32 temporaries
    return use


def _pick_tile_d(D, target=32):
    """Largest divisor of D not exceeding `target` (whole D when it is small)."""
    if D <= target:
        return D
    best = 1
    for cand in range(2, target + 1):
        if D % cand == 0:
            best = cand
    return best


def _pick_tile_h(B, C, H, W, tile_d, in_bytes, out_bytes, multi_chunk, budget):
    if H % 8 != 0:
        return H                                    # block must span full H extent
    # (a) keep the f32 accumulator + working tiles register-resident,
    # (b) guarantee >=2 parallel grid steps when B == 1 (v7x has 2 TensorCores),
    # (c) fit double-buffered blocks + rotation scratch in the VMEM budget.
    reg_cap = max(8, ((20 * 1024) // W) // 8 * 8)
    core_cap = H if B >= 2 else max(8, (H // 2) // 8 * 8)
    tile_h = 8
    for cand in range(8, H + 1, 8):
        if H % cand:
            continue
        if (cand <= reg_cap and cand <= core_cap and
                _block_vmem_bytes(C, cand, W, tile_d, in_bytes, out_bytes,
                                  multi_chunk) <= budget):
            tile_h = cand
    return tile_h


def cost_volume_dot(un_l, un_r, *, max_disp=192, stem_stride=2, direction=1,
                    tile_h=None, tile_d=None, out_dtype=None):
    assert un_l.shape == un_r.shape and un_l.ndim == 4
    B, C, H, W = un_l.shape
    D = max_disp // stem_stride
    assert D >= 1
    # The circular roll matches the reference's slice-based shift only while every
    # disparity shift stays strictly below the image width.
    assert (D - 1) * abs(direction) < W, "max disparity shift must be < image width"

    out_dtype = un_l.dtype if out_dtype is None else out_dtype
    in_bytes = jnp.dtype(un_l.dtype).itemsize
    out_bytes = jnp.dtype(out_dtype).itemsize

    if tile_d is None:
        tile_d = _pick_tile_d(D)
    assert D % tile_d == 0
    multi_chunk = tile_d != D

    cap = _vmem_capacity_bytes()
    budget = int(0.70 * cap)        # ~90 MiB on 128-MiB parts, ~45 MiB on v7x
    if tile_h is None:
        tile_h = _pick_tile_h(B, C, H, W, tile_d, in_bytes, out_bytes,
                              multi_chunk, budget)
    assert H % tile_h == 0

    need = _block_vmem_bytes(C, tile_h, W, tile_d, in_bytes, out_bytes, multi_chunk)
    vmem_limit = int(min(0.80 * cap, max(1.3 * need, 32 << 20)))
    vmem_limit = max(vmem_limit, int(1.1 * need))   # never starve a forced tile

    kernel = functools.partial(
        _cost_volume_kernel, tile_d=tile_d, direction=direction,
        single_chunk=not multi_chunk)
    scratch_shapes = (
        [pltpu.VMEM((C, tile_h, W), un_r.dtype)] if multi_chunk else [])

    return pl.pallas_call(
        kernel,
        out_shape=jax.ShapeDtypeStruct((B, 1, D, H, W), out_dtype),
        grid=(B, H // tile_h, D // tile_d),
        in_specs=[
            pl.BlockSpec((1, C, tile_h, W), lambda b, h, dk: (b, 0, h, 0)),
            pl.BlockSpec((1, C, tile_h, W), lambda b, h, dk: (b, 0, h, 0)),
        ],
        out_specs=pl.BlockSpec((1, 1, tile_d, tile_h, W),
                               lambda b, h, dk: (b, 0, dk, h, 0)),
        scratch_shapes=scratch_shapes,
        compiler_params=pltpu.CompilerParams(
            dimension_semantics=("parallel", "parallel", "arbitrary"),
            vmem_limit_bytes=vmem_limit,
        ),
    )(un_l, un_r)


def _reference(un_l, un_r, num_disp, direction):
    # Pure-JAX mirror of the PyTorch forward pass (same slice-based shift).
    outs = [jnp.sum(un_l * un_r, axis=1, keepdims=True)]
    for d in range(1, num_disp):
        s = d * direction
        shifted = jnp.concatenate(
            [un_r[:, :, :, -s:], un_r[:, :, :, :-s]], axis=3)
        outs.append(jnp.sum(un_l * shifted, axis=1, keepdims=True))
    return jnp.stack(outs, axis=2)


if __name__ == "__main__":
    key = jax.random.PRNGKey(0)

    # Config 1: small D (single disparity chunk), multiple batches and H tiles.
    B, C, H, W = 2, 4, 16, 128
    max_disp, stem_stride = 16, 2            # -> D = 8
    k_l, k_r, key = jax.random.split(key, 3)
    un_l = jax.random.normal(k_l, (B, C, H, W), dtype=jnp.float32)
    un_r = jax.random.normal(k_r, (B, C, H, W), dtype=jnp.float32)
    D = max_disp // stem_stride
    for direction in (1, -1):
        out = cost_volume_dot(un_l, un_r, max_disp=max_disp,
                              stem_stride=stem_stride, direction=direction,
                              tile_h=8)      # force >1 H-tile to exercise the grid
        out = jax.block_until_ready(out)
        ref = _reference(un_l, un_r, D, direction)
        np.testing.assert_allclose(np.asarray(out), np.asarray(ref),
                                   rtol=1e-5, atol=1e-5)
        assert out.shape == (B, 1, D, H, W)

    # Config 2: larger D split into disparity chunks -- exercises the persistent
    # rotation scratch and the chunk re-seed/advance path, with a single batch.
    B, C, H, W = 1, 8, 16, 128
    max_disp, stem_stride = 64, 2            # -> D = 32
    k_l, k_r, key = jax.random.split(key, 3)
    un_l = jax.random.normal(k_l, (B, C, H, W), dtype=jnp.float32)
    un_r = jax.random.normal(k_r, (B, C, H, W), dtype=jnp.float32)
    D = max_disp // stem_stride
    for direction in (1, -1):
        out = cost_volume_dot(un_l, un_r, max_disp=max_disp,
                              stem_stride=stem_stride, direction=direction,
                              tile_d=16)     # 2 disparity chunks
        out = jax.block_until_ready(out)
        ref = _reference(un_l, un_r, D, direction)
        np.testing.assert_allclose(np.asarray(out), np.asarray(ref),
                                   rtol=1e-5, atol=1e-5)
        assert out.shape == (B, 1, D, H, W)

    print("KERNEL_OK")
</pallas_src>

<mosaic_0001>
module attributes {stable_mosaic.version = 11 : i64} {
  func.func @_cost_volume_kernel(%arg0: i32, %arg1: i32, %arg2: i32, %arg3: memref<1x4x8x128xf32, #tpu.memory_space<vmem>>, %arg4: memref<1x4x8x128xf32, #tpu.memory_space<vmem>>, %arg5: memref<1x1x8x8x128xf32, #tpu.memory_space<vmem>>) attributes {dimension_semantics = [#tpu.dimension_semantics<parallel>, #tpu.dimension_semantics<parallel>, #tpu.dimension_semantics<arbitrary>], iteration_bounds = array<i64: 2, 2, 1>, scalar_prefetch = 0 : i64, scratch_operands = 0 : i64, tpu.core_type = #tpu.core_type<tc>, window_params = [{transform_indices = @transform_0, window_bounds = array<i64: 1, 4, 8, 128>}, {transform_indices = @transform_1, window_bounds = array<i64: 1, 4, 8, 128>}, {transform_indices = @transform_2, window_bounds = array<i64: 1, 1, 8, 8, 128>}]} {
    %c0 = arith.constant 0 : index
    %c0_0 = arith.constant 0 : index
    %c0_1 = arith.constant 0 : index
    %c0_2 = arith.constant 0 : index
    %0 = vector.load %arg4[%c0, %c0_0, %c0_1, %c0_2] : memref<1x4x8x128xf32, #tpu.memory_space<vmem>>, vector<1x1x8x128xf32>
    %1 = vector.shape_cast %0 : vector<1x1x8x128xf32> to vector<8x128xf32>
    %c0_3 = arith.constant 0 : index
    %c0_4 = arith.constant 0 : index
    %c0_5 = arith.constant 0 : index
    %c0_6 = arith.constant 0 : index
    %2 = vector.load %arg3[%c0_3, %c0_4, %c0_5, %c0_6] : memref<1x4x8x128xf32, #tpu.memory_space<vmem>>, vector<1x1x8x128xf32>
    %3 = vector.shape_cast %2 : vector<1x1x8x128xf32> to vector<8x128xf32>
    %4 = arith.mulf %3, %1 : vector<8x128xf32>
    %c0_7 = arith.constant 0 : index
    %c1 = arith.constant 1 : index
    %c0_8 = arith.constant 0 : index
    %c0_9 = arith.constant 0 : index
    %5 = vector.load %arg4[%c0_7, %c1, %c0_8, %c0_9] : memref<1x4x8x128xf32, #tpu.memory_space<vmem>>, vector<1x1x8x128xf32>
    %6 = vector.shape_cast %5 : vector<1x1x8x128xf32> to vector<8x128xf32>
    %c0_10 = arith.constant 0 : index
    %c1_11 = arith.constant 1 : index
    %c0_12 = arith.constant 0 : index
    %c0_13 = arith.constant 0 : index
    %7 = vector.load %arg3[%c0_10, %c1_11, %c0_12, %c0_13] : memref<1x4x8x128xf32, #tpu.memory_space<vmem>>, vector<1x1x8x128xf32>
    %8 = vector.shape_cast %7 : vector<1x1x8x128xf32> to vector<8x128xf32>
    %9 = arith.mulf %8, %6 : vector<8x128xf32>
    %10 = arith.addf %4, %9 : vector<8x128xf32>
    %c0_14 = arith.constant 0 : index
    %c2 = arith.constant 2 : index
    %c0_15 = arith.constant 0 : index
    %c0_16 = arith.constant 0 : index
    %11 = vector.load %arg4[%c0_14, %c2, %c0_15, %c0_16] : memref<1x4x8x128xf32, #tpu.memory_space<vmem>>, vector<1x1x8x128xf32>
    %12 = vector.shape_cast %11 : vector<1x1x8x128xf32> to vector<8x128xf32>
    %c0_17 = arith.constant 0 : index
    %c2_18 = arith.constant 2 : index
    %c0_19 = arith.constant 0 : index
    %c0_20 = arith.constant 0 : index
    %13 = vector.load %arg3[%c0_17, %c2_18, %c0_19, %c0_20] : memref<1x4x8x128xf32, #tpu.memory_space<vmem>>, vector<1x1x8x128xf32>
    %14 = vector.shape_cast %13 : vector<1x1x8x128xf32> to vector<8x128xf32>
    %15 = arith.mulf %14, %12 : vector<8x128xf32>
    %16 = arith.addf %10, %15 : vector<8x128xf32>
    %c0_21 = arith.constant 0 : index
    %c3 = arith.constant 3 : index
    %c0_22 = arith.constant 0 : index
    %c0_23 = arith.constant 0 : index
    %17 = vector.load %arg4[%c0_21, %c3, %c0_22, %c0_23] : memref<1x4x8x128xf32, #tpu.memory_space<vmem>>, vector<1x1x8x128xf32>
    %18 = vector.shape_cast %17 : vector<1x1x8x128xf32> to vector<8x128xf32>
    %c0_24 = arith.constant 0 : index
    %c3_25 = arith.constant 3 : index
    %c0_26 = arith.constant 0 : index
    %c0_27 = arith.constant 0 : index
    %19 = vector.load %arg3[%c0_24, %c3_25, %c0_26, %c0_27] : memref<1x4x8x128xf32, #tpu.memory_space<vmem>>, vector<1x1x8x128xf32>
    %20 = vector.shape_cast %19 : vector<1x1x8x128xf32> to vector<8x128xf32>
    %21 = arith.mulf %20, %18 : vector<8x128xf32>
    %22 = arith.addf %16, %21 : vector<8x128xf32>
    %c0_28 = arith.constant 0 : index
    %c0_29 = arith.constant 0 : index
    %c0_30 = arith.constant 0 : index
    %c0_31 = arith.constant 0 : index
    %c0_32 = arith.constant 0 : index
    %23 = vector.load %arg5[%c0_28, %c0_29, %c0_30, %c0_31, %c0_32] : memref<1x1x8x8x128xf32, #tpu.memory_space<vmem>>, vector<1x1x1x8x128xf32>
    %24 = vector.shape_cast %23 : vector<1x1x1x8x128xf32> to vector<8x128xf32>
    %25 = vector.shape_cast %22 : vector<8x128xf32> to vector<1x1x1x8x128xf32>
    tpu.vector_store %arg5[%c0_28, %c0_29, %c0_30, %c0_31, %c0_32], %25 {strides = array<i32>} : memref<1x1x8x8x128xf32, #tpu.memory_space<vmem>>, vector<1x1x1x8x128xf32>,
    %c0_33 = arith.constant 0 : index
    %c0_34 = arith.constant 0 : index
    %c0_35 = arith.constant 0 : index
    %c0_36 = arith.constant 0 : index
    %26 = vector.load %arg4[%c0_33, %c0_34, %c0_35, %c0_36] : memref<1x4x8x128xf32, #tpu.memory_space<vmem>>, vector<1x1x8x128xf32>
    %27 = vector.shape_cast %26 : vector<1x1x8x128xf32> to vector<8x128xf32>
    %c1_i32 = arith.constant 1 : i32
    %28 = tpu.dynamic_rotate %27 by %c1_i32 dim 1 : vector<8x128xf32>, i32 -> vector<8x128xf32>
    %c0_37 = arith.constant 0 : index
    %c0_38 = arith.constant 0 : index
    %c0_39 = arith.constant 0 : index
    %c0_40 = arith.constant 0 : index
    %29 = vector.load %arg3[%c0_37, %c0_38, %c0_39, %c0_40] : memref<1x4x8x128xf32, #tpu.memory_space<vmem>>, vector<1x1x8x128xf32>
    %30 = vector.shape_cast %29 : vector<1x1x8x128xf32> to vector<8x128xf32>
    %31 = arith.mulf %30, %28 : vector<8x128xf32>
    %c0_41 = arith.constant 0 : index
    %c1_42 = arith.constant 1 : index
    %c0_43 = arith.constant 0 : index
    %c0_44 = arith.constant 0 : index
    %32 = vector.load %arg4[%c0_41, %c1_42, %c0_43, %c0_44] : memref<1x4x8x128xf32, #tpu.memory_space<vmem>>, vector<1x1x8x128xf32>
    %33 = vector.shape_cast %32 : vector<1x1x8x128xf32> to vector<8x128xf32>
    %c1_i32_45 = arith.constant 1 : i32
    %34 = tpu.dynamic_rotate %33 by %c1_i32_45 dim 1 : vector<8x128xf32>, i32 -> vector<8x128xf32>
    %c0_46 = arith.constant 0 : index
    %c1_47 = arith.constant 1 : index
    %c0_48 = arith.constant 0 : index
    %c0_49 = arith.constant 0 : index
    %35 = vector.load %arg3[%c0_46, %c1_47, %c0_48, %c0_49] : memref<1x4x8x128xf32, #tpu.memory_space<vmem>>, vector<1x1x8x128xf32>
    %36 = vector.shape_cast %35 : vector<1x1x8x128xf32> to vector<8x128xf32>
    %37 = arith.mulf %36, %34 : vector<8x128xf32>
    %38 = arith.addf %31, %37 : vector<8x128xf32>
    %c0_50 = arith.constant 0 : index
    %c2_51 = arith.constant 2 : index
    %c0_52 = arith.constant 0 : index
    %c0_53 = arith.constant 0 : index
    %39 = vector.load %arg4[%c0_50, %c2_51, %c0_52, %c0_53] : memref<1x4x8x128xf32, #tpu.memory_space<vmem>>, vector<1x1x8x128xf32>
    %40 = vector.shape_cast %39 : vector<1x1x8x128xf32> to vector<8x128xf32>
    %c1_i32_54 = arith.constant 1 : i32
    %41 = tpu.dynamic_rotate %40 by %c1_i32_54 dim 1 : vector<8x128xf32>, i32 -> vector<8x128xf32>
    %c0_55 = arith.constant 0 : index
    %c2_56 = arith.constant 2 : index
    %c0_57 = arith.constant 0 : index
    %c0_58 = arith.constant 0 : index
    %42 = vector.load %arg3[%c0_55, %c2_56, %c0_57, %c0_58] : memref<1x4x8x128xf32, #tpu.memory_space<vmem>>, vector<1x1x8x128xf32>
    %43 = vector.shape_cast %42 : vector<1x1x8x128xf32> to vector<8x128xf32>
    %44 = arith.mulf %43, %41 : vector<8x128xf32>
    %45 = arith.addf %38, %44 : vector<8x128xf32>
    %c0_59 = arith.constant 0 : index
    %c3_60 = arith.constant 3 : index
    %c0_61 = arith.constant 0 : index
    %c0_62 = arith.constant 0 : index
    %46 = vector.load %arg4[%c0_59, %c3_60, %c0_61, %c0_62] : memref<1x4x8x128xf32, #tpu.memory_space<vmem>>, vector<1x1x8x128xf32>
    %47 = vector.shape_cast %46 : vector<1x1x8x128xf32> to vector<8x128xf32>
    %c1_i32_63 = arith.constant 1 : i32
    %48 = tpu.dynamic_rotate %47 by %c1_i32_63 dim 1 : vector<8x128xf32>, i32 -> vector<8x128xf32>
    %c0_64 = arith.constant 0 : index
    %c3_65 = arith.constant 3 : index
    %c0_66 = arith.constant 0 : index
    %c0_67 = arith.constant 0 : index
    %49 = vector.load %arg3[%c0_64, %c3_65, %c0_66, %c0_67] : memref<1x4x8x128xf32, #tpu.memory_space<vmem>>, vector<1x1x8x128xf32>
    %50 = vector.shape_cast %49 : vector<1x1x8x128xf32> to vector<8x128xf32>
    %51 = arith.mulf %50, %48 : vector<8x128xf32>
    %52 = arith.addf %45, %51 : vector<8x128xf32>
    %c0_68 = arith.constant 0 : index
    %c0_69 = arith.constant 0 : index
    %c1_70 = arith.constant 1 : index
    %c0_71 = arith.constant 0 : index
    %c0_72 = arith.constant 0 : index
    %53 = vector.load %arg5[%c0_68, %c0_69, %c1_70, %c0_71, %c0_72] : memref<1x1x8x8x128xf32, #tpu.memory_space<vmem>>, vector<1x1x1x8x128xf32>
    %54 = vector.shape_cast %53 : vector<1x1x1x8x128xf32> to vector<8x128xf32>
    %55 = vector.shape_cast %52 : vector<8x128xf32> to vector<1x1x1x8x128xf32>
    tpu.vector_store %arg5[%c0_68, %c0_69, %c1_70, %c0_71, %c0_72], %55 {strides = array<i32>} : memref<1x1x8x8x128xf32, #tpu.memory_space<vmem>>, vector<1x1x1x8x128xf32>,
    %c0_73 = arith.constant 0 : index
    %c0_74 = arith.constant 0 : index
    %c0_75 = arith.constant 0 : index
    %c0_76 = arith.constant 0 : index
    %56 = vector.load %arg4[%c0_73, %c0_74, %c0_75, %c0_76] : memref<1x4x8x128xf32, #tpu.memory_space<vmem>>, vector<1x1x8x128xf32>
    %57 = vector.shape_cast %56 : vector<1x1x8x128xf32> to vector<8x128xf32>
    %c2_i32 = arith.constant 2 : i32
    %58 = tpu.dynamic_rotate %57 by %c2_i32 dim 1 : vector<8x128xf32>, i32 -> vector<8x128xf32>
    %c0_77 = arith.constant 0 : index
    %c0_78 = arith.constant 0 : index
    %c0_79 = arith.constant 0 : index
    %c0_80 = arith.constant 0 : index
    %59 = vector.load %arg3[%c0_77, %c0_78, %c0_79, %c0_80] : memref<1x4x8x128xf32, #tpu.memory_space<vmem>>, vector<1x1x8x128xf32>
    %60 = vector.shape_cast %59 : vector<1x1x8x128xf32> to vector<8x128xf32>
    %61 = arith.mulf %60, %58 : vector<8x128xf32>
    %c0_81 = arith.constant 0 : index
    %c1_82 = arith.constant 1 : index
    %c0_83 = arith.constant 0 : index
    %c0_84 = arith.constant 0 : index
    %62 = vector.load %arg4[%c0_81, %c1_82, %c0_83, %c0_84] : memref<1x4x8x128xf32, #tpu.memory_space<vmem>>, vector<1x1x8x128xf32>
    %63 = vector.shape_cast %62 : vector<1x1x8x128xf32> to vector<8x128xf32>
    %c2_i32_85 = arith.constant 2 : i32
    %64 = tpu.dynamic_rotate %63 by %c2_i32_85 dim 1 : vector<8x128xf32>, i32 -> vector<8x128xf32>
    %c0_86 = arith.constant 0 : index
    %c1_87 = arith.constant 1 : index
    %c0_88 = arith.constant 0 : index
    %c0_89 = arith.constant 0 : index
    %65 = vector.load %arg3[%c0_86, %c1_87, %c0_88, %c0_89] : memref<1x4x8x128xf32, #tpu.memory_space<vmem>>, vector<1x1x8x128xf32>
    %66 = vector.shape_cast %65 : vector<1x1x8x128xf32> to vector<8x128xf32>
    %67 = arith.mulf %66, %64 : vector<8x128xf32>
    %68 = arith.addf %61, %67 : vector<8x128xf32>
    %c0_90 = arith.constant 0 : index
    %c2_91 = arith.constant 2 : index
    %c0_92 = arith.constant 0 : index
    %c0_93 = arith.constant 0 : index
    %69 = vector.load %arg4[%c0_90, %c2_91, %c0_92, %c0_93] : memref<1x4x8x128xf32, #tpu.memory_space<vmem>>, vector<1x1x8x128xf32>
    %70 = vector.shape_cast %69 : vector<1x1x8x128xf32> to vector<8x128xf32>
    %c2_i32_94 = arith.constant 2 : i32
    %71 = tpu.dynamic_rotate %70 by %c2_i32_94 dim 1 : vector<8x128xf32>, i32 -> vector<8x128xf32>
    %c0_95 = arith.constant 0 : index
    %c2_96 = arith.constant 2 : index
    %c0_97 = arith.constant 0 : index
    %c0_98 = arith.constant 0 : index
    %72 = vector.load %arg3[%c0_95, %c2_96, %c0_97, %c0_98] : memref<1x4x8x128xf32, #tpu.memory_space<vmem>>, vector<1x1x8x128xf32>
    %73 = vector.shape_cast %72 : vector<1x1x8x128xf32> to vector<8x128xf32>
    %74 = arith.mulf %73, %71 : vector<8x128xf32>
    %75 = arith.addf %68, %74 : vector<8x128xf32>
    %c0_99 = arith.constant 0 : index
    %c3_100 = arith.constant 3 : index
    %c0_101 = arith.constant 0 : index
    %c0_102 = arith.constant 0 : index
    %76 = vector.load %arg4[%c0_99, %c3_100, %c0_101, %c0_102] : memref<1x4x8x128xf32, #tpu.memory_space<vmem>>, vector<1x1x8x128xf32>
    %77 = vector.shape_cast %76 : vector<1x1x8x128xf32> to vector<8x128xf32>
    %c2_i32_103 = arith.constant 2 : i32
    %78 = tpu.dynamic_rotate %77 by %c2_i32_103 dim 1 : vector<8x128xf32>, i32 -> vector<8x128xf32>
    %c0_104 = arith.constant 0 : index
    %c3_105 = arith.constant 3 : index
    %c0_106 = arith.constant 0 : index
    %c0_107 = arith.constant 0 : index
    %79 = vector.load %arg3[%c0_104, %c3_105, %c0_106, %c0_107] : memref<1x4x8x128xf32, #tpu.memory_space<vmem>>, vector<1x1x8x128xf32>
    %80 = vector.shape_cast %79 : vector<1x1x8x128xf32> to vector<8x128xf32>
    %81 = arith.mulf %80, %78 : vector<8x128xf32>
    %82 = arith.addf %75, %81 : vector<8x128xf32>
    %c0_108 = arith.constant 0 : index
    %c0_109 = arith.constant 0 : index
    %c2_110 = arith.constant 2 : index
    %c0_111 = arith.constant 0 : index
    %c0_112 = arith.constant 0 : index
    %83 = vector.load %arg5[%c0_108, %c0_109, %c2_110, %c0_111, %c0_112] : memref<1x1x8x8x128xf32, #tpu.memory_space<vmem>>, vector<1x1x1x8x128xf32>
    %84 = vector.shape_cast %83 : vector<1x1x1x8x128xf32> to vector<8x128xf32>
    %85 = vector.shape_cast %82 : vector<8x128xf32> to vector<1x1x1x8x128xf32>
    tpu.vector_store %arg5[%c0_108, %c0_109, %c2_110, %c0_111, %c0_112], %85 {strides = array<i32>} : memref<1x1x8x8x128xf32, #tpu.memory_space<vmem>>, vector<1x1x1x8x128xf32>,
    %c0_113 = arith.constant 0 : index
    %c0_114 = arith.constant 0 : index
    %c0_115 = arith.constant 0 : index
    %c0_116 = arith.constant 0 : index
    %86 = vector.load %arg4[%c0_113, %c0_114, %c0_115, %c0_116] : memref<1x4x8x128xf32, #tpu.memory_space<vmem>>, vector<1x1x8x128xf32>
    %87 = vector.shape_cast %86 : vector<1x1x8x128xf32> to vector<8x128xf32>
    %c3_i32 = arith.constant 3 : i32
    %88 = tpu.dynamic_rotate %87 by %c3_i32 dim 1 : vector<8x128xf32>, i32 -> vector<8x128xf32>
    %c0_117 = arith.constant 0 : index
    %c0_118 = arith.constant 0 : index
    %c0_119 = arith.constant 0 : index
    %c0_120 = arith.constant 0 : index
    %89 = vector.load %arg3[%c0_117, %c0_118, %c0_119, %c0_120] : memref<1x4x8x128xf32, #tpu.memory_space<vmem>>, vector<1x1x8x128xf32>
    %90 = vector.shape_cast %89 : vector<1x1x8x128xf32> to vector<8x128xf32>
    %91 = arith.mulf %90, %88 : vector<8x128xf32>
    %c0_121 = arith.constant 0 : index
    %c1_122 = arith.constant 1 : index
    %c0_123 = arith.constant 0 : index
    %c0_124 = arith.constant 0 : index
    %92 = vector.load %arg4[%c0_121, %c1_122, %c0_123, %c0_124] : memref<1x4x8x128xf32, #tpu.memory_space<vmem>>, vector<1x1x8x128xf32>
    %93 = vector.shape_cast %92 : vector<1x1x8x128xf32> to vector<8x128xf32>
    %c3_i32_125 = arith.constant 3 : i32
    %94 = tpu.dynamic_rotate %93 by %c3_i32_125 dim 1 : vector<8x128xf32>, i32 -> vector<8x128xf32>
    %c0_126 = arith.constant 0 : index
    %c1_127 = arith.constant 1 : index
    %c0_128 = arith.constant 0 : index
    %c0_129 = arith.constant 0 : index
    %95 = vector.load %arg3[%c0_126, %c1_127, %c0_128, %c0_129] : memref<1x4x8x128xf32, #tpu.memory_space<vmem>>, vector<1x1x8x128xf32>
    %96 = vector.shape_cast %95 : vector<1x1x8x128xf32> to vector<8x128xf32>
    %97 = arith.mulf %96, %94 : vector<8x128xf32>
    %98 = arith.addf %91, %97 : vector<8x128xf32>
    %c0_130 = arith.constant 0 : index
    %c2_131 = arith.constant 2 : index
    %c0_132 = arith.constant 0 : index
    %c0_133 = arith.constant 0 : index
    %99 = vector.load %arg4[%c0_130, %c2_131, %c0_132, %c0_133] : memref<1x4x8x128xf32, #tpu.memory_space<vmem>>, vector<1x1x8x128xf32>
    %100 = vector.shape_cast %99 : vector<1x1x8x128xf32> to vector<8x128xf32>
    %c3_i32_134 = arith.constant 3 : i32
    %101 = tpu.dynamic_rotate %100 by %c3_i32_134 dim 1 : vector<8x128xf32>, i32 -> vector<8x128xf32>
    %c0_135 = arith.constant 0 : index
    %c2_136 = arith.constant 2 : index
    %c0_137 = arith.constant 0 : index
    %c0_138 = arith.constant 0 : index
    %102 = vector.load %arg3[%c0_135, %c2_136, %c0_137, %c0_138] : memref<1x4x8x128xf32, #tpu.memory_space<vmem>>, vector<1x1x8x128xf32>
    %103 = vector.shape_cast %102 : vector<1x1x8x128xf32> to vector<8x128xf32>
    %104 = arith.mulf %103, %101 : vector<8x128xf32>
    %105 = arith.addf %98, %104 : vector<8x128xf32>
    %c0_139 = arith.constant 0 : index
    %c3_140 = arith.constant 3 : index
    %c0_141 = arith.constant 0 : index
    %c0_142 = arith.constant 0 : index
    %106 = vector.load %arg4[%c0_139, %c3_140, %c0_141, %c0_142] : memref<1x4x8x128xf32, #tpu.memory_space<vmem>>, vector<1x1x8x128xf32>
    %107 = vector.shape_cast %106 : vector<1x1x8x128xf32> to vector<8x128xf32>
    %c3_i32_143 = arith.constant 3 : i32
    %108 = tpu.dynamic_rotate %107 by %c3_i32_143 dim 1 : vector<8x128xf32>, i32 -> vector<8x128xf32>
    %c0_144 = arith.constant 0 : index
    %c3_145 = arith.constant 3 : index
    %c0_146 = arith.constant 0 : index
    %c0_147 = arith.constant 0 : index
    %109 = vector.load %arg3[%c0_144, %c3_145, %c0_146, %c0_147] : memref<1x4x8x128xf32, #tpu.memory_space<vmem>>, vector<1x1x8x128xf32>
    %110 = vector.shape_cast %109 : vector<1x1x8x128xf32> to vector<8x128xf32>
    %111 = arith.mulf %110, %108 : vector<8x128xf32>
    %112 = arith.addf %105, %111 : vector<8x128xf32>
    %c0_148 = arith.constant 0 : index
    %c0_149 = arith.constant 0 : index
    %c3_150 = arith.constant 3 : index
    %c0_151 = arith.constant 0 : index
    %c0_152 = arith.constant 0 : index
    %113 = vector.load %arg5[%c0_148, %c0_149, %c3_150, %c0_151, %c0_152] : memref<1x1x8x8x128xf32, #tpu.memory_space<vmem>>, vector<1x1x1x8x128xf32>
    %114 = vector.shape_cast %113 : vector<1x1x1x8x128xf32> to vector<8x128xf32>
    %115 = vector.shape_cast %112 : vector<8x128xf32> to vector<1x1x1x8x128xf32>
    tpu.vector_store %arg5[%c0_148, %c0_149, %c3_150, %c0_151, %c0_152], %115 {strides = array<i32>} : memref<1x1x8x8x128xf32, #tpu.memory_space<vmem>>, vector<1x1x1x8x128xf32>,
    %c0_153 = arith.constant 0 : index
    %c0_154 = arith.constant 0 : index
    %c0_155 = arith.constant 0 : index
    %c0_156 = arith.constant 0 : index
    %116 = vector.load %arg4[%c0_153, %c0_154, %c0_155, %c0_156] : memref<1x4x8x128xf32, #tpu.memory_space<vmem>>, vector<1x1x8x128xf32>
    %117 = vector.shape_cast %116 : vector<1x1x8x128xf32> to vector<8x128xf32>
    %c4_i32 = arith.constant 4 : i32
    %118 = tpu.dynamic_rotate %117 by %c4_i32 dim 1 : vector<8x128xf32>, i32 -> vector<8x128xf32>
    %c0_157 = arith.constant 0 : index
    %c0_158 = arith.constant 0 : index
    %c0_159 = arith.constant 0 : index
    %c0_160 = arith.constant 0 : index
    %119 = vector.load %arg3[%c0_157, %c0_158, %c0_159, %c0_160] : memref<1x4x8x128xf32, #tpu.memory_space<vmem>>, vector<1x1x8x128xf32>
    %120 = vector.shape_cast %119 : vector<1x1x8x128xf32> to vector<8x128xf32>
    %121 = arith.mulf %120, %118 : vector<8x128xf32>
    %c0_161 = arith.constant 0 : index
    %c1_162 = arith.constant 1 : index
    %c0_163 = arith.constant 0 : index
    %c0_164 = arith.constant 0 : index
    %122 = vector.load %arg4[%c0_161, %c1_162, %c0_163, %c0_164] : memref<1x4x8x128xf32, #tpu.memory_space<vmem>>, vector<1x1x8x128xf32>
    %123 = vector.shape_cast %122 : vector<1x1x8x128xf32> to vector<8x128xf32>
    %c4_i32_165 = arith.constant 4 : i32
    %124 = tpu.dynamic_rotate %123 by %c4_i32_165 dim 1 : vector<8x128xf32>, i32 -> vector<8x128xf32>
    %c0_166 = arith.constant 0 : index
    %c1_167 = arith.constant 1 : index
    %c0_168 = arith.constant 0 : index
    %c0_169 = arith.constant 0 : index
    %125 = vector.load %arg3[%c0_166, %c1_167, %c0_168, %c0_169] : memref<1x4x8x128xf32, #tpu.memory_space<vmem>>, vector<1x1x8x128xf32>
    %126 = vector.shape_cast %125 : vector<1x1x8x128xf32> to vector<8x128xf32>
    %127 = arith.mulf %126, %124 : vector<8x128xf32>
    %128 = arith.addf %121, %127 : vector<8x128xf32>
    %c0_170 = arith.constant 0 : index
    %c2_171 = arith.constant 2 : index
    %c0_172 = arith.constant 0 : index
    %c0_173 = arith.constant 0 : index
    %129 = vector.load %arg4[%c0_170, %c2_171, %c0_172, %c0_173] : memref<1x4x8x128xf32, #tpu.memory_space<vmem>>, vector<1x1x8x128xf32>
    %130 = vector.shape_cast %129 : vector<1x1x8x128xf32> to vector<8x128xf32>
    %c4_i32_174 = arith.constant 4 : i32
    %131 = tpu.dynamic_rotate %130 by %c4_i32_174 dim 1 : vector<8x128xf32>, i32 -> vector<8x128xf32>
    %c0_175 = arith.constant 0 : index
    %c2_176 = arith.constant 2 : index
    %c0_177 = arith.constant 0 : index
    %c0_178 = arith.constant 0 : index
    %132 = vector.load %arg3[%c0_175, %c2_176, %c0_177, %c0_178] : memref<1x4x8x128xf32, #tpu.memory_space<vmem>>, vector<1x1x8x128xf32>
    %133 = vector.shape_cast %132 : vector<1x1x8x128xf32> to vector<8x128xf32>
    %134 = arith.mulf %133, %131 : vector<8x128xf32>
    %135 = arith.addf %128, %134 : vector<8x128xf32>
    %c0_179 = arith.constant 0 : index
    %c3_180 = arith.constant 3 : index
    %c0_181 = arith.constant 0 : index
    %c0_182 = arith.constant 0 : index
    %136 = vector.load %arg4[%c0_179, %c3_180, %c0_181, %c0_182] : memref<1x4x8x128xf32, #tpu.memory_space<vmem>>, vector<1x1x8x128xf32>
    %137 = vector.shape_cast %136 : vector<1x1x8x128xf32> to vector<8x128xf32>
    %c4_i32_183 = arith.constant 4 : i32
    %138 = tpu.dynamic_rotate %137 by %c4_i32_183 dim 1 : vector<8x128xf32>, i32 -> vector<8x128xf32>
    %c0_184 = arith.constant 0 : index
    %c3_185 = arith.constant 3 : index
    %c0_186 = arith.constant 0 : index
    %c0_187 = arith.constant 0 : index
    %139 = vector.load %arg3[%c0_184, %c3_185, %c0_186, %c0_187] : memref<1x4x8x128xf32, #tpu.memory_space<vmem>>, vector<1x1x8x128xf32>
    %140 = vector.shape_cast %139 : vector<1x1x8x128xf32> to vector<8x128xf32>
    %141 = arith.mulf %140, %138 : vector<8x128xf32>
    %142 = arith.addf %135, %141 : vector<8x128xf32>
    %c0_188 = arith.constant 0 : index
    %c0_189 = arith.constant 0 : index
    %c4 = arith.constant 4 : index
    %c0_190 = arith.constant 0 : index
    %c0_191 = arith.constant 0 : index
    %143 = vector.load %arg5[%c0_188, %c0_189, %c4, %c0_190, %c0_191] : memref<1x1x8x8x128xf32, #tpu.memory_space<vmem>>, vector<1x1x1x8x128xf32>
    %144 = vector.shape_cast %143 : vector<1x1x1x8x128xf32> to vector<8x128xf32>
    %145 = vector.shape_cast %142 : vector<8x128xf32> to vector<1x1x1x8x128xf32>
    tpu.vector_store %arg5[%c0_188, %c0_189, %c4, %c0_190, %c0_191], %145 {strides = array<i32>} : memref<1x1x8x8x128xf32, #tpu.memory_space<vmem>>, vector<1x1x1x8x128xf32>,
    %c0_192 = arith.constant 0 : index
    %c0_193 = arith.constant 0 : index
    %c0_194 = arith.constant 0 : index
    %c0_195 = arith.constant 0 : index
    %146 = vector.load %arg4[%c0_192, %c0_193, %c0_194, %c0_195] : memref<1x4x8x128xf32, #tpu.memory_space<vmem>>, vector<1x1x8x128xf32>
    %147 = vector.shape_cast %146 : vector<1x1x8x128xf32> to vector<8x128xf32>
    %c5_i32 = arith.constant 5 : i32
    %148 = tpu.dynamic_rotate %147 by %c5_i32 dim 1 : vector<8x128xf32>, i32 -> vector<8x128xf32>
    %c0_196 = arith.constant 0 : index
    %c0_197 = arith.constant 0 : index
    %c0_198 = arith.constant 0 : index
    %c0_199 = arith.constant 0 : index
    %149 = vector.load %arg3[%c0_196, %c0_197, %c0_198, %c0_199] : memref<1x4x8x128xf32, #tpu.memory_space<vmem>>, vector<1x1x8x128xf32>
    %150 = vector.shape_cast %149 : vector<1x1x8x128xf32> to vector<8x128xf32>
    %151 = arith.mulf %150, %148 : vector<8x128xf32>
    %c0_200 = arith.constant 0 : index
    %c1_201 = arith.constant 1 : index
    %c0_202 = arith.constant 0 : index
    %c0_203 = arith.constant 0 : index
    %152 = vector.load %arg4[%c0_200, %c1_201, %c0_202, %c0_203] : memref<1x4x8x128xf32, #tpu.memory_space<vmem>>, vector<1x1x8x128xf32>
    %153 = vector.shape_cast %152 : vector<1x1x8x128xf32> to vector<8x128xf32>
    %c5_i32_204 = arith.constant 5 : i32
    %154 = tpu.dynamic_rotate %153 by %c5_i32_204 dim 1 : vector<8x128xf32>, i32 -> vector<8x128xf32>
    %c0_205 = arith.constant 0 : index
    %c1_206 = arith.constant 1 : index
    %c0_207 = arith.constant 0 : index
    %c0_208 = arith.constant 0 : index
    %155 = vector.load %arg3[%c0_205, %c1_206, %c0_207, %c0_208] : memref<1x4x8x128xf32, #tpu.memory_space<vmem>>, vector<1x1x8x128xf32>
    %156 = vector.shape_cast %155 : vector<1x1x8x128xf32> to vector<8x128xf32>
    %157 = arith.mulf %156, %154 : vector<8x128xf32>
    %158 = arith.addf %151, %157 : vector<8x128xf32>
    %c0_209 = arith.constant 0 : index
    %c2_210 = arith.constant 2 : index
    %c0_211 = arith.constant 0 : index
    %c0_212 = arith.constant 0 : index
    %159 = vector.load %arg4[%c0_209, %c2_210, %c0_211, %c0_212] : memref<1x4x8x128xf32, #tpu.memory_space<vmem>>, vector<1x1x8x128xf32>
    %160 = vector.shape_cast %159 : vector<1x1x8x128xf32> to vector<8x128xf32>
    %c5_i32_213 = arith.constant 5 : i32
    %161 = tpu.dynamic_rotate %160 by %c5_i32_213 dim 1 : vector<8x128xf32>, i32 -> vector<8x128xf32>
    %c0_214 = arith.constant 0 : index
    %c2_215 = arith.constant 2 : index
    %c0_216 = arith.constant 0 : index
    %c0_217 = arith.constant 0 : index
    %162 = vector.load %arg3[%c0_214, %c2_215, %c0_216, %c0_217] : memref<1x4x8x128xf32, #tpu.memory_space<vmem>>, vector<1x1x8x128xf32>
    %163 = vector.shape_cast %162 : vector<1x1x8x128xf32> to vector<8x128xf32>
    %164 = arith.mulf %163, %161 : vector<8x128xf32>
    %165 = arith.addf %158, %164 : vector<8x128xf32>
    %c0_218 = arith.constant 0 : index
    %c3_219 = arith.constant 3 : index
    %c0_220 = arith.constant 0 : index
    %c0_221 = arith.constant 0 : index
    %166 = vector.load %arg4[%c0_218, %c3_219, %c0_220, %c0_221] : memref<1x4x8x128xf32, #tpu.memory_space<vmem>>, vector<1x1x8x128xf32>
    %167 = vector.shape_cast %166 : vector<1x1x8x128xf32> to vector<8x128xf32>
    %c5_i32_222 = arith.constant 5 : i32
    %168 = tpu.dynamic_rotate %167 by %c5_i32_222 dim 1 : vector<8x128xf32>, i32 -> vector<8x128xf32>
    %c0_223 = arith.constant 0 : index
    %c3_224 = arith.constant 3 : index
    %c0_225 = arith.constant 0 : index
    %c0_226 = arith.constant 0 : index
    %169 = vector.load %arg3[%c0_223, %c3_224, %c0_225, %c0_226] : memref<1x4x8x128xf32, #tpu.memory_space<vmem>>, vector<1x1x8x128xf32>
    %170 = vector.shape_cast %169 : vector<1x1x8x128xf32> to vector<8x128xf32>
    %171 = arith.mulf %170, %168 : vector<8x128xf32>
    %172 = arith.addf %165, %171 : vector<8x128xf32>
    %c0_227 = arith.constant 0 : index
    %c0_228 = arith.constant 0 : index
    %c5 = arith.constant 5 : index
    %c0_229 = arith.constant 0 : index
    %c0_230 = arith.constant 0 : index
    %173 = vector.load %arg5[%c0_227, %c0_228, %c5, %c0_229, %c0_230] : memref<1x1x8x8x128xf32, #tpu.memory_space<vmem>>, vector<1x1x1x8x128xf32>
    %174 = vector.shape_cast %173 : vector<1x1x1x8x128xf32> to vector<8x128xf32>
    %175 = vector.shape_cast %172 : vector<8x128xf32> to vector<1x1x1x8x128xf32>
    tpu.vector_store %arg5[%c0_227, %c0_228, %c5, %c0_229, %c0_230], %175 {strides = array<i32>} : memref<1x1x8x8x128xf32, #tpu.memory_space<vmem>>, vector<1x1x1x8x128xf32>,
    %c0_231 = arith.constant 0 : index
    %c0_232 = arith.constant 0 : index
    %c0_233 = arith.constant 0 : index
    %c0_234 = arith.constant 0 : index
    %176 = vector.load %arg4[%c0_231, %c0_232, %c0_233, %c0_234] : memref<1x4x8x128xf32, #tpu.memory_space<vmem>>, vector<1x1x8x128xf32>
    %177 = vector.shape_cast %176 : vector<1x1x8x128xf32> to vector<8x128xf32>
    %c6_i32 = arith.constant 6 : i32
    %178 = tpu.dynamic_rotate %177 by %c6_i32 dim 1 : vector<8x128xf32>, i32 -> vector<8x128xf32>
    %c0_235 = arith.constant 0 : index
    %c0_236 = arith.constant 0 : index
    %c0_237 = arith.constant 0 : index
    %c0_238 = arith.constant 0 : index
    %179 = vector.load %arg3[%c0_235, %c0_236, %c0_237, %c0_238] : memref<1x4x8x128xf32, #tpu.memory_space<vmem>>, vector<1x1x8x128xf32>
    %180 = vector.shape_cast %179 : vector<1x1x8x128xf32> to vector<8x128xf32>
    %181 = arith.mulf %180, %178 : vector<8x128xf32>
    %c0_239 = arith.constant 0 : index
    %c1_240 = arith.constant 1 : index
    %c0_241 = arith.constant 0 : index
    %c0_242 = arith.constant 0 : index
    %182 = vector.load %arg4[%c0_239, %c1_240, %c0_241, %c0_242] : memref<1x4x8x128xf32, #tpu.memory_space<vmem>>, vector<1x1x8x128xf32>
    %183 = vector.shape_cast %182 : vector<1x1x8x128xf32> to vector<8x128xf32>
    %c6_i32_243 = arith.constant 6 : i32
    %184 = tpu.dynamic_rotate %183 by %c6_i32_243 dim 1 : vector<8x128xf32>, i32 -> vector<8x128xf32>
    %c0_244 = arith.constant 0 : index
    %c1_245 = arith.constant 1 : index
    %c0_246 = arith.constant 0 : index
    %c0_247 = arith.constant 0 : index
    %185 = vector.load %arg3[%c0_244, %c1_245, %c0_246, %c0_247] : memref<1x4x8x128xf32, #tpu.memory_space<vmem>>, vector<1x1x8x128xf32>
    %186 = vector.shape_cast %185 : vector<1x1x8x128xf32> to vector<8x128xf32>
    %187 = arith.mulf %186, %184 : vector<8x128xf32>
    %188 = arith.addf %181, %187 : vector<8x128xf32>
    %c0_248 = arith.constant 0 : index
    %c2_249 = arith.constant 2 : index
    %c0_250 = arith.constant 0 : index
    %c0_251 = arith.constant 0 : index
    %189 = vector.load %arg4[%c0_248, %c2_249, %c0_250, %c0_251] : memref<1x4x8x128xf32, #tpu.memory_space<vmem>>, vector<1x1x8x128xf32>
    %190 = vector.shape_cast %189 : vector<1x1x8x128xf32> to vector<8x128xf32>
    %c6_i32_252 = arith.constant 6 : i32
    %191 = tpu.dynamic_rotate %190 by %c6_i32_252 dim 1 : vector<8x128xf32>, i32 -> vector<8x128xf32>
    %c0_253 = arith.constant 0 : index
    %c2_254 = arith.constant 2 : index
    %c0_255 = arith.constant 0 : index
    %c0_256 = arith.constant 0 : index
    %192 = vector.load %arg3[%c0_253, %c2_254, %c0_255, %c0_256] : memref<1x4x8x128xf32, #tpu.memory_space<vmem>>, vector<1x1x8x128xf32>
    %193 = vector.shape_cast %192 : vector<1x1x8x128xf32> to vector<8x128xf32>
    %194 = arith.mulf %193, %191 : vector<8x128xf32>
    %195 = arith.addf %188, %194 : vector<8x128xf32>
    %c0_257 = arith.constant 0 : index
    %c3_258 = arith.constant 3 : index
    %c0_259 = arith.constant 0 : index
    %c0_260 = arith.constant 0 : index
    %196 = vector.load %arg4[%c0_257, %c3_258, %c0_259, %c0_260] : memref<1x4x8x128xf32, #tpu.memory_space<vmem>>, vector<1x1x8x128xf32>
    %197 = vector.shape_cast %196 : vector<1x1x8x128xf32> to vector<8x128xf32>
    %c6_i32_261 = arith.constant 6 : i32
    %198 = tpu.dynamic_rotate %197 by %c6_i32_261 dim 1 : vector<8x128xf32>, i32 -> vector<8x128xf32>
    %c0_262 = arith.constant 0 : index
    %c3_263 = arith.constant 3 : index
    %c0_264 = arith.constant 0 : index
    %c0_265 = arith.constant 0 : index
    %199 = vector.load %arg3[%c0_262, %c3_263, %c0_264, %c0_265] : memref<1x4x8x128xf32, #tpu.memory_space<vmem>>, vector<1x1x8x128xf32>
    %200 = vector.shape_cast %199 : vector<1x1x8x128xf32> to vector<8x128xf32>
    %201 = arith.mulf %200, %198 : vector<8x128xf32>
    %202 = arith.addf %195, %201 : vector<8x128xf32>
    %c0_266 = arith.constant 0 : index
    %c0_267 = arith.constant 0 : index
    %c6 = arith.constant 6 : index
    %c0_268 = arith.constant 0 : index
    %c0_269 = arith.constant 0 : index
    %203 = vector.load %arg5[%c0_266, %c0_267, %c6, %c0_268, %c0_269] : memref<1x1x8x8x128xf32, #tpu.memory_space<vmem>>, vector<1x1x1x8x128xf32>
    %204 = vector.shape_cast %203 : vector<1x1x1x8x128xf32> to vector<8x128xf32>
    %205 = vector.shape_cast %202 : vector<8x128xf32> to vector<1x1x1x8x128xf32>
    tpu.vector_store %arg5[%c0_266, %c0_267, %c6, %c0_268, %c0_269], %205 {strides = array<i32>} : memref<1x1x8x8x128xf32, #tpu.memory_space<vmem>>, vector<1x1x1x8x128xf32>,
    %c0_270 = arith.constant 0 : index
    %c0_271 = arith.constant 0 : index
    %c0_272 = arith.constant 0 : index
    %c0_273 = arith.constant 0 : index
    %206 = vector.load %arg4[%c0_270, %c0_271, %c0_272, %c0_273] : memref<1x4x8x128xf32, #tpu.memory_space<vmem>>, vector<1x1x8x128xf32>
    %207 = vector.shape_cast %206 : vector<1x1x8x128xf32> to vector<8x128xf32>
    %c7_i32 = arith.constant 7 : i32
    %208 = tpu.dynamic_rotate %207 by %c7_i32 dim 1 : vector<8x128xf32>, i32 -> vector<8x128xf32>
    %c0_274 = arith.constant 0 : index
    %c0_275 = arith.constant 0 : index
    %c0_276 = arith.constant 0 : index
    %c0_277 = arith.constant 0 : index
    %209 = vector.load %arg3[%c0_274, %c0_275, %c0_276, %c0_277] : memref<1x4x8x128xf32, #tpu.memory_space<vmem>>, vector<1x1x8x128xf32>
    %210 = vector.shape_cast %209 : vector<1x1x8x128xf32> to vector<8x128xf32>
    %211 = arith.mulf %210, %208 : vector<8x128xf32>
    %c0_278 = arith.constant 0 : index
    %c1_279 = arith.constant 1 : index
    %c0_280 = arith.constant 0 : index
    %c0_281 = arith.constant 0 : index
    %212 = vector.load %arg4[%c0_278, %c1_279, %c0_280, %c0_281] : memref<1x4x8x128xf32, #tpu.memory_space<vmem>>, vector<1x1x8x128xf32>
    %213 = vector.shape_cast %212 : vector<1x1x8x128xf32> to vector<8x128xf32>
    %c7_i32_282 = arith.constant 7 : i32
    %214 = tpu.dynamic_rotate %213 by %c7_i32_282 dim 1 : vector<8x128xf32>, i32 -> vector<8x128xf32>
    %c0_283 = arith.constant 0 : index
    %c1_284 = arith.constant 1 : index
    %c0_285 = arith.constant 0 : index
    %c0_286 = arith.constant 0 : index
    %215 = vector.load %arg3[%c0_283, %c1_284, %c0_285, %c0_286] : memref<1x4x8x128xf32, #tpu.memory_space<vmem>>, vector<1x1x8x128xf32>
    %216 = vector.shape_cast %215 : vector<1x1x8x128xf32> to vector<8x128xf32>
    %217 = arith.mulf %216, %214 : vector<8x128xf32>
    %218 = arith.addf %211, %217 : vector<8x128xf32>
    %c0_287 = arith.constant 0 : index
    %c2_288 = arith.constant 2 : index
    %c0_289 = arith.constant 0 : index
    %c0_290 = arith.constant 0 : index
    %219 = vector.load %arg4[%c0_287, %c2_288, %c0_289, %c0_290] : memref<1x4x8x128xf32, #tpu.memory_space<vmem>>, vector<1x1x8x128xf32>
    %220 = vector.shape_cast %219 : vector<1x1x8x128xf32> to vector<8x128xf32>
    %c7_i32_291 = arith.constant 7 : i32
    %221 = tpu.dynamic_rotate %220 by %c7_i32_291 dim 1 : vector<8x128xf32>, i32 -> vector<8x128xf32>
    %c0_292 = arith.constant 0 : index
    %c2_293 = arith.constant 2 : index
    %c0_294 = arith.constant 0 : index
    %c0_295 = arith.constant 0 : index
    %222 = vector.load %arg3[%c0_292, %c2_293, %c0_294, %c0_295] : memref<1x4x8x128xf32, #tpu.memory_space<vmem>>, vector<1x1x8x128xf32>
    %223 = vector.shape_cast %222 : vector<1x1x8x128xf32> to vector<8x128xf32>
    %224 = arith.mulf %223, %221 : vector<8x128xf32>
    %225 = arith.addf %218, %224 : vector<8x128xf32>
    %c0_296 = arith.constant 0 : index
    %c3_297 = arith.constant 3 : index
    %c0_298 = arith.constant 0 : index
    %c0_299 = arith.constant 0 : index
    %226 = vector.load %arg4[%c0_296, %c3_297, %c0_298, %c0_299] : memref<1x4x8x128xf32, #tpu.memory_space<vmem>>, vector<1x1x8x128xf32>
    %227 = vector.shape_cast %226 : vector<1x1x8x128xf32> to vector<8x128xf32>
    %c7_i32_300 = arith.constant 7 : i32
    %228 = tpu.dynamic_rotate %227 by %c7_i32_300 dim 1 : vector<8x128xf32>, i32 -> vector<8x128xf32>
    %c0_301 = arith.constant 0 : index
    %c3_302 = arith.constant 3 : index
    %c0_303 = arith.constant 0 : index
    %c0_304 = arith.constant 0 : index
    %229 = vector.load %arg3[%c0_301, %c3_302, %c0_303, %c0_304] : memref<1x4x8x128xf32, #tpu.memory_space<vmem>>, vector<1x1x8x128xf32>
    %230 = vector.shape_cast %229 : vector<1x1x8x128xf32> to vector<8x128xf32>
    %231 = arith.mulf %230, %228 : vector<8x128xf32>
    %232 = arith.addf %225, %231 : vector<8x128xf32>
    %c0_305 = arith.constant 0 : index
    %c0_306 = arith.constant 0 : index
    %c7 = arith.constant 7 : index
    %c0_307 = arith.constant 0 : index
    %c0_308 = arith.constant 0 : index
    %233 = vector.load %arg5[%c0_305, %c0_306, %c7, %c0_307, %c0_308] : memref<1x1x8x8x128xf32, #tpu.memory_space<vmem>>, vector<1x1x1x8x128xf32>
    %234 = vector.shape_cast %233 : vector<1x1x1x8x128xf32> to vector<8x128xf32>
    %235 = vector.shape_cast %232 : vector<8x128xf32> to vector<1x1x1x8x128xf32>
    tpu.vector_store %arg5[%c0_305, %c0_306, %c7, %c0_307, %c0_308], %235 {strides = array<i32>} : memref<1x1x8x8x128xf32, #tpu.memory_space<vmem>>, vector<1x1x1x8x128xf32>,
    return
  }
  func.func @transform_0(%arg0: i32, %arg1: i32, %arg2: i32) -> (i32, i32, i32, i32) {
    %c0_i32 = arith.constant 0 : i32
    %c0_i32_0 = arith.constant 0 : i32
    %c0_i32_1 = arith.constant 0 : i32
    return %arg0, %c0_i32, %arg1, %c0_i32_0 : i32, i32, i32, i32
  }
  func.func @transform_1(%arg0: i32, %arg1: i32, %arg2: i32) -> (i32, i32, i32, i32) {
    %c0_i32 = arith.constant 0 : i32
    %c0_i32_0 = arith.constant 0 : i32
    %c0_i32_1 = arith.constant 0 : i32
    return %arg0, %c0_i32, %arg1, %c0_i32_0 : i32, i32, i32, i32
  }
  func.func @transform_2(%arg0: i32, %arg1: i32, %arg2: i32) -> (i32, i32, i32, i32, i32) {
    %c0_i32 = arith.constant 0 : i32
    %c0_i32_0 = arith.constant 0 : i32
    %c0_i32_1 = arith.constant 0 : i32
    return %arg0, %c0_i32, %arg2, %arg1, %c0_i32_0 : i32, i32, i32, i32, i32
  }
}

</mosaic_0001>

<bundles_post_ra>
// kernel: tpu_custom_call.1
= control target key start
LH: loop header
LB: loop body
LE: loop exit
PB: predicated region body
PF: predicated region fallthrough
CT: control target
= control target key end

     0   :  { %s1281_s0 = inlined_call_operand.hbm [shape: f32[2,4,16,128], index: 0, kind: input, shape index: {}]   ;;  %s1282_s1 = inlined_call_operand.hbm [shape: f32[2,4,16,128], index: 1, kind: input, shape index: {}]   ;;  %s1283_s2 = inlined_call_operand.hbm [shape: f32[2,1,8,16,128], index: 2, kind: output, shape index: {}]  }
   0x1   :  { %1289 = sst [smem:[#allocation13_spill]] %s1281_s0 }
   0x2   :  { %7 = vsyncpa [#allocation3], 0 }
   0x3   :  { %9 = vsyncpa [#allocation3 + $0x1], 0 }
   0x4   :  { %10 = vsyncpa [#allocation6], 0 }
   0x5   :  { %12 = vsyncpa [#allocation6 + $0x1], 0 }
   0x6   :  { %13 = vsyncpa [#allocation4], 0 }
   0x7   :  { %15 = vsyncpa [#allocation4 + $0x1], 0  ;;  %s930_s9 = smov 0   ;;  %s932_s10 = smov 0  }
   0x8   :  { %s934_s11 = smov 0   ;;  %s936_s12 = smov 0  }
   0x9   :  { %s938_s13 = smov 0   ;;  %s940_s14 = smov 0  }
   0xa   :  { %s942_s15 = smov 0   ;;  %s944_s16 = smov 0  }
   0xb LB: > { %s565_s17 = sadd.s32 4294967295, %s897_s16   ;;  %s566_s18 = sadd.s32 4294967294, %s897_s16   ;;  %s897_s16 = sphi %s944_s16, %s21_s16   ;;  %s893_s15 = sphi %s942_s15, %s1311_s15   ;;  %s889_s14 = sphi %s940_s14, %s1310_s14   ;;  %s885_s13 = sphi %s938_s13, %s1309_s13   ;;  %s881_s12 = sphi %s936_s12, %s1308_s12   ;;  %s877_s11 = sphi %s934_s11, %s1307_s11   ;;  %s873_s10 = sphi %s932_s10, %s1306_s10   ;;  %s869_s9 = sphi %s930_s9, %s1305_s9  }
   0xc   : > { %s36_s19 = sadd.s32 1, %s889_s14  ;;  %s40_s20 = sadd.s32 1, %s893_s15 }
   0xd   : > { %p38_p0 = scmp.ge.s32.totalorder %s36_s19, 2  ;;  %s49_s21 = sadd.s32 1, %s877_s11 }
   0xe   : > { %p56_p1 = scmp.ne.s32.totalorder %s877_s11, %s873_s10  ;;  %p57_p2 = scmp.eq.s32.totalorder %s897_s16, 0 }
   0xf   : > { %s1313_s19 = smov (%p38_p0, %s36_s19), 0  ;;  %s1315_s20 = smov (!%p38_p0, %s40_s20), %s893_s15 }
  0x10   : > { %1290 = sst [smem:[#allocation11_spill]] %s1313_s19  ;;  %s45_s22 = ssub.s32 %s889_s14, %s1313_s19 }
  0x11   : > { %p983_p3 = por %p57_p2, %p56_p1  ;;  %p42_p4 = scmp.ge.s32.totalorder %s1315_s20, 2 }
  0x12   : > { %p62_p5 = scmp.ne.s32.totalorder %s873_s10, %s869_s9  ;;  %p63_p6 = scmp.eq.s32.totalorder %s565_s17, 0 }
  0x13   : > { %p118_p7 = scmp.eq.s32.totalorder %s565_s17, 3  ;;  %s1317_s20 = smov (%p42_p4, %s1315_s20), 0 }
  0x14   : > { %1292 = sst [smem:[#allocation12_spill]] %s1317_s20  ;;  %p991_p8 = por %p63_p6, %p62_p5 }
  0x15   : > { %p995_p9 = por %p118_p7, %p56_p1  ;;  %s44_s26 = ssub.s32 %s893_s15, %s1317_s20 }
  0x16   : > { %s1293_s24 = scalar_select %p991_p8, 1, 0 }
  0x17   : > { %s1294_s25 = scalar_select %p995_p9, 1, 0 }
  0x18   : > { %p124_p10 = scmp.eq.s32.totalorder %s566_s18, 3  ;;  %s46_s27 = sor.u32 %s45_s22, %s44_s26 }
  0x19   : > { %p47_p11 = scmp.eq.s32.totalorder %s46_s27, 0  ;;  %p656_p13 = scmp.lt.s32.totalorder %s897_s16, 4 }
  0x1a   : > { %p1001_p12 = por %p124_p10, %p62_p5  ;;  %s1007_s29 = sand.u32 1, %s877_s11  }
  0x1b   : > { %s1010_s30 = scalar_select %p47_p11, %s877_s11, %s49_s21  }
  0x1c   : > { %s1295_s28 = scalar_select %p1001_p12, 1, 0 }
  0x1d   : > { %s1284_s3 = sshll.u32 %s1007_s29, 5  ;;  %s570_s4 = sshll.u32 %s893_s15, 3 }
  0x1e   : > { %s1015_s5 = sadd.s32 %s889_s14, %s570_s4  ;;  %s148_s6 = scalar_lea.vmem [#allocation2], %s1284_s3 }
  0x1f   : > { %s156_s7 = sshll.u32 %s148_s6, 4  ;;  %s571_s8 = sshll.u32 %s1015_s5, 7  ;;  %s1020_s7 = int_to_ptr.vmem [resolvable:$true] %s156_s7 }
  0x20   : > { %s1296_s0 = sld [smem:[#allocation13_spill]]  ;;  %p1031_p0 = pnand %p656_p13, %p983_p3 }
  0x21   : > { %s145_s26 = scalar_lea.sflag [#allocation3], %s1007_s29 }
  0x22   : > { %p737_p2 = pneg %p1031_p0 }
  0x26   : > { %s1027_s22 = scalar_lea.hbm %s1296_s0, %s571_s8  ;;  %s740_s6 = scalar_lea.hbm %s1296_s0, 2048 }
  0x27   : > { %s735_s27 = scalar_lea.hbm %s1027_s22, 512  ;;  %p741_p3 = scmp.lt.u32.totalorder %s1027_s22, %s1296_s0 }
  0x28   : > { %p736_p1 = scmp.ne.s32.totalorder %s1027_s22, %s735_s27  ;;  %p742_p6 = scmp.lt.u32.totalorder %s740_s6, %s735_s27 }
  0x29   : > { %p744_p10 = scmp.lt.u32.totalorder %s735_s27, %s1027_s22 }
  0x2a   : > { %p738_p4 = pnand %p737_p2, %p736_p1  ;;  %p743_p7 = por %p742_p6, %p741_p3 }
  0x2c   : > { %p739_p5 = pneg %p738_p4  ;;  %p745_p11 = por %p744_p10, %p743_p7 }
  0x2e   : > { %p746_p13 = pnand %p745_p11, %p739_p5 }
  0x30   : > { %749 = shalt.err (!%p746_p13)
}
  0x31   : > { %s750_s3 = scalar_lea.vmem %s1020_s7, 512  ;;  %s899_s23 = smov [#allocation2]  }
  0x32   : > { %p751_p1 = scmp.ne.s32.totalorder %s1020_s7, %s750_s3  ;;  %s755_s4 = sshll.u32 %s899_s23, 4  ;;  %s756_s4 = int_to_ptr.vmem [resolvable:$false] %s755_s4 }
  0x33   : > { %s757_s17 = scalar_lea.vmem %s756_s4, 1024  ;;  %p758_p9 = scmp.lt.s32.totalorder %s1020_s7, %s756_s4 }
  0x34   : > { %p753_p4 = pnand %p751_p1, %p737_p2  ;;  %p759_p3 = scmp.lt.s32.totalorder %s757_s17, %s750_s3 }
  0x36   : > { %p754_p12 = pneg %p753_p4  ;;  %p760_p6 = por %p759_p3, %p758_p9 }
  0x38   : > { %p761_p7 = pnand %p760_p6, %p754_p12 }
  0x3a   : > { %764 = shalt.err (!%p761_p7)
}
  0x3b   : > { %s900_s27 = smov 256   ;;  %s901_s6 = smov 128  }
  0x3c   : > { %s902_s18 = smov 8   ;;  %p575_p9 = scmp.ge.s32.totalorder %s897_s16, 1 }
  0x3d   : > { %648 = dma.hbm_to_vmem [thread:$0]  (!%p1031_p0), %s1027_s22, 512, %s1020_s7, %s145_s26, %s900_s27, %s901_s6, %s902_s18  }
  0x3e   : > { %p186_p12 = scmp.lt.s32.totalorder %s897_s16, 5  ;;  %s1077_s17 = scalar_lea.hbm %s1282_s1, %s571_s8 }
  0x3f   : > { %s1299_s0 = sshll.u32 %s1007_s29, 5  ;;  %s167_s7 = scalar_lea.sflag [#allocation6], %s1007_s29 }
  0x40   : > { %p1068_p5 = pnand %p575_p9, %p186_p12  ;;  %s170_s20 = scalar_lea.vmem [#allocation5], %s1299_s0 }
  0x41   : > { %s178_s19 = sshll.u32 %s170_s20, 4  ;;  %s765_s22 = scalar_lea.hbm %s1077_s17, 512  ;;  %s1081_s19 = int_to_ptr.vmem [resolvable:$true] %s178_s19 }
  0x42   : > { %p766_p10 = scmp.ne.s32.totalorder %s1077_s17, %s765_s22  ;;  %s770_s8 = scalar_lea.hbm %s1282_s1, 2048 }
  0x43   : > { %p771_p1 = scmp.lt.u32.totalorder %s1077_s17, %s1282_s1  ;;  %p772_p4 = scmp.lt.u32.totalorder %s770_s8, %s765_s22 }
  0x44   : > { %p768_p11 = pnand %p766_p10, %p737_p2  ;;  %p774_p6 = scmp.lt.u32.totalorder %s765_s22, %s1077_s17 }
  0x45   : > { %p773_p3 = por %p772_p4, %p771_p1 }
  0x46   : > { %p769_p13 = pneg %p768_p11 }
  0x47   : > { %p775_p7 = por %p774_p6, %p773_p3 }
  0x49   : > { %p776_p9 = pnand %p775_p7, %p769_p13 }
  0x4b   : > { %779 = shalt.err (!%p776_p9)
}
  0x4c   : > { %s780_s0 = scalar_lea.vmem %s1081_s19, 512  ;;  %s903_s20 = smov [#allocation5]  }
  0x4d   : > { %p781_p12 = scmp.ne.s32.totalorder %s1081_s19, %s780_s0  ;;  %s785_s5 = sshll.u32 %s903_s20, 4  ;;  %s786_s5 = int_to_ptr.vmem [resolvable:$false] %s785_s5 }
  0x4e   : > { %s787_s26 = scalar_lea.vmem %s786_s5, 1024  ;;  %p788_p8 = scmp.lt.s32.totalorder %s1081_s19, %s786_s5 }
  0x4f   : > { %p783_p10 = pnand %p781_p12, %p737_p2  ;;  %p789_p1 = scmp.lt.s32.totalorder %s787_s26, %s780_s0 }
  0x51   : > { %p784_p11 = pneg %p783_p10  ;;  %p790_p4 = por %p789_p1, %p788_p8 }
  0x53   : > { %p791_p3 = pnand %p790_p4, %p784_p11 }
  0x55   : > { %794 = shalt.err (!%p791_p3)
}
  0x56   : > { %651 = dma.hbm_to_vmem [thread:$0]  (!%p1031_p0), %s1077_s17, 512, %s1081_s19, %s167_s7, %s900_s27, %s901_s6, %s902_s18  }
  0x57   : > { %190 = sbr.rel (%p1068_p5) target bundleno = 285 (0x11d), region = 28  ;;  %s1115_s22 = sand.u32 (!%p1068_p5), 1, %s873_s10  }
  0x58   : > { %s576_s8 = sshll.u32 (!%p1068_p5), %s1115_s22, 5  ;;  %s193_s23 = scalar_lea.sflag (!%p1068_p5), [#allocation3], %s1115_s22 }
  0x59   : > { %s1119_s21 = scalar_lea.vmem (!%p1068_p5), [#allocation2], %s576_s8  ;;  %p1300_p8 = scmp.ne.s32.totalorder (!%p1068_p5), %s1293_s24, 0 }
  0x5e   : > { %856 = dma.done.wait (%p1300_p8), %s193_s23, 512  }
  0x5f   : > { %858 = vsyncadd (%p1300_p8), %s193_s23, 4294966784  ;;  %s202_s19 = scalar_lea.sflag [#allocation6], %s1115_s22  ;;  %s1126_s29 = scalar_lea.vmem [#allocation5], %s576_s8 }
  0x60   : > { %860 = dma.done.wait (%p1300_p8), %s202_s19, 512  }
  0x61   : > { %862 = vsyncadd (%p1300_p8), %s202_s19, 4294966784  ;;  %v279_v0 = vld [vmem:[%s1126_s29] sm:$0xff]  ;;  %s904_s27 = smov 2   ;;  %s905_s6 = smov 1   ;;  %v592_v1 = vld [vmem:[%s1126_s29 + $0x8] sm:$0xff] }
  0x62   : > { %280 = vrot.lane.b32.xlu1 %v279_v0, %s904_s27  ;;  %255 = vrot.lane.b32.xlu0 %v279_v0, %s905_s6  ;;  %s906_s18 = smov 3   ;;  %s907_s24 = smov 4   ;;  %v594_v2 = vld [vmem:[%s1126_s29 + $0x10] sm:$0xff]  ;;  %v1150_v3 = vld [vmem:[%s1119_s21] sm:$0xff] }
  0x63   : > { %s908_s3 = smov 5   ;;  %s909_s17 = smov 6   ;;  %v1153_v4 = vld [vmem:[%s1119_s21 + $0x8] sm:$0xff]  ;;  %v1156_v5 = vld [vmem:[%s1119_s21 + $0x10] sm:$0xff]  ;;  %v234_v6 = vmul.f32 %v1150_v3, %v279_v0  ;;  %v589_v9 = vld [vmem:[%s1126_s29 + $0x18] sm:$0xff] }
  0x64   : > { %s910_s7 = smov 7   ;;  %v239_v7 = vmul.f32 %v1153_v4, %v592_v1  ;;  %v245_v8 = vmul.f32 %v1156_v5, %v594_v2  ;;  %v1163_v10 = vld [vmem:[%s1119_s21 + $0x18] sm:$0xff]  ;;  %s578_s4 = sshll.u32 %s1115_s22, 6 }
  0x65   : > { %v251_v12 = vmul.f32 %v1163_v10, %v589_v9  ;;  %s1171_s0 = scalar_lea.vmem [#allocation7], %s578_s4  ;;  %s635_s20 = sshll.u32 %s885_s13, 4 }
  0x66   : > { %285 = vrot.lane.b32.xlu1 %v592_v1, %s904_s27  ;;  %260 = vrot.lane.b32.xlu0 %v592_v1, %s905_s6  ;;  %v240_v11 = vadd.f32 %v239_v7, %v234_v6  ;;  %s444_s13 = sadd.s32 %s881_s12, %s635_s20  ;;  %s447_s5 = sshll.u32 %s1171_s0, 4  ;;  %s1216_s5 = int_to_ptr.vmem [resolvable:$true] %s447_s5 }
  0x67   : > { %s636_s12 = sshll.u32 %s444_s13, 7  ;;  %s430_s21 = scalar_lea.sflag [#allocation4], %s1115_s22 }
  0x68   : > { %v246_v13 = vadd.f32 %v245_v8, %v240_v11  ;;  %s1225_s23 = scalar_lea.hbm %s1283_s2, %s636_s12  ;;  %s795_s19 = scalar_lea.vmem %s1216_s5, 1024 }
  0x69   : > { %p796_p0 = scmp.ne.s32.totalorder %s1216_s5, %s795_s19  ;;  %p1301_p2 = scmp.ne.s32.totalorder %s1294_s25, 0 }
  0x6a   : > { %310 = vrot.lane.b32.xlu1 %v592_v1, %s906_s18  ;;  %305 = vrot.lane.b32.xlu0 %v279_v0, %s906_s18  ;;  %v252_v14 = vadd.f32 %v251_v12, %v246_v13  ;;  %s911_s29 = smov [#allocation7]  }
  0x6b   : > { %p797_p5 = pnand %p796_p0, %p1301_p2 }
  0x6c   : > { %253 = vst [vmem:[%s1171_s0] sm:$0xff] %v252_v14 }
  0x6d   : > { %p798_p13 = pneg %p797_p5 }
  0x6e   : > { %335 = vrot.lane.b32.xlu1 %v592_v1, %s907_s24  ;;  %330 = vrot.lane.b32.xlu0 %v279_v0, %s907_s24 }
  0x72   : > { %360 = vrot.lane.b32.xlu1 %v592_v1, %s908_s3  ;;  %355 = vrot.lane.b32.xlu0 %v279_v0, %s908_s3 }
  0x76   : > { %385 = vrot.lane.b32.xlu1 %v592_v1, %s909_s17  ;;  %380 = vrot.lane.b32.xlu0 %v279_v0, %s909_s17 }
  0x7a   : > { %410 = vrot.lane.b32.xlu1 %v592_v1, %s910_s7  ;;  %405 = vrot.lane.b32.xlu0 %v279_v0, %s910_s7 }
  0x7e   : > { %291 = vrot.lane.b32.xlu1 %v594_v2, %s904_s27  ;;  %266 = vrot.lane.b32.xlu0 %v594_v2, %s905_s6 }
  0x82   : > { %341 = vrot.lane.b32.xlu1 %v594_v2, %s907_s24  ;;  %316 = vrot.lane.b32.xlu0 %v594_v2, %s906_s18 }
  0x86   : > { %391 = vrot.lane.b32.xlu1 %v594_v2, %s909_s17  ;;  %366 = vrot.lane.b32.xlu0 %v594_v2, %s908_s3 }
  0x8a   : > { %272 = vrot.lane.b32.xlu1 %v589_v9, %s905_s6  ;;  %416 = vrot.lane.b32.xlu0 %v594_v2, %s910_s7 }
  0x8e   : > { %322 = vrot.lane.b32.xlu1 %v589_v9, %s906_s18  ;;  %297 = vrot.lane.b32.xlu0 %v589_v9, %s904_s27  ;;  %s799_s27 = sshll.u32 %s911_s29, 4  ;;  %s800_s27 = int_to_ptr.vmem [resolvable:$false] %s799_s27 }
  0x8f   : > { %s801_s6 = scalar_lea.vmem %s800_s27, 2048  ;;  %p802_p6 = scmp.lt.s32.totalorder %s1216_s5, %s800_s27 }
  0x90   : > { %p803_p7 = scmp.lt.s32.totalorder %s801_s6, %s795_s19 }
  0x92   : > { %372 = vrot.lane.b32.xlu1 %v589_v9, %s908_s3  ;;  %347 = vrot.lane.b32.xlu0 %v589_v9, %s907_s24  ;;  %p804_p9 = por %p803_p7, %p802_p6 }
  0x94   : > { %p805_p12 = pnand %p804_p9, %p798_p13 }
  0x96   : > { %422 = vrot.lane.b32.xlu1 %v589_v9, %s910_s7  ;;  %397 = vrot.lane.b32.xlu0 %v589_v9, %s909_s17 }
  0xd4   : > { %v281_v15 = vpop.permute.xlu1 %280  ;;  %v256_v16 = vpop.permute.xlu0 %255 }
  0xd5   : > { %v258_v36 = vmul.f32 %v1150_v3, %v256_v16  ;;  %v283_v39 = vmul.f32 %v1150_v3, %v281_v15 }
  0xd8   : > { %v286_v17 = vpop.permute.xlu1 %285  ;;  %v261_v18 = vpop.permute.xlu0 %260 }
  0xd9   : > { %v263_v33 = vmul.f32 %v1153_v4, %v261_v18  ;;  %v288_v37 = vmul.f32 %v1153_v4, %v286_v17 }
  0xdb   : > { %v264_v40 = vadd.f32 %v263_v33, %v258_v36  ;;  %v289_v46 = vadd.f32 %v288_v37, %v283_v39 }
  0xdc   : > { %v311_v19 = vpop.permute.xlu1 %310  ;;  %v306_v20 = vpop.permute.xlu0 %305 }
  0xdd   : > { %v313_v41 = vmul.f32 %v1153_v4, %v311_v19  ;;  %v308_v42 = vmul.f32 %v306_v20, %v1150_v3 }
  0xdf   : > { %v314_v54 = vadd.f32 %v313_v41, %v308_v42 }
  0xe0   : > { %v336_v21 = vpop.permute.xlu1 %335  ;;  %v331_v22 = vpop.permute.xlu0 %330 }
  0xe1   : > { %v338_v50 = vmul.f32 %v1153_v4, %v336_v21  ;;  %v333_v51 = vmul.f32 %v331_v22, %v1150_v3 }
  0xe3   : > { %v339_v0 = vadd.f32 %v338_v50, %v333_v51 }
  0xe4   : > { %v361_v23 = vpop.permute.xlu1 %360  ;;  %v356_v24 = vpop.permute.xlu0 %355 }
  0xe5   : > { %v363_v52 = vmul.f32 %v1153_v4, %v361_v23  ;;  %v358_v53 = vmul.f32 %v356_v24, %v1150_v3 }
  0xe7   : > { %v364_v1 = vadd.f32 %v363_v52, %v358_v53 }
  0xe8   : > { %v386_v25 = vpop.permute.xlu1 %385  ;;  %v381_v26 = vpop.permute.xlu0 %380 }
  0xe9   : > { %v388_v2 = vmul.f32 %v1153_v4, %v386_v25  ;;  %v383_v6 = vmul.f32 %v381_v26, %v1150_v3 }
  0xec   : > { %v411_v27 = vpop.permute.xlu1 %410  ;;  %v406_v28 = vpop.permute.xlu0 %405 }
  0xed   : > { %v413_v7 = vmul.f32 %v1153_v4, %v411_v27  ;;  %v408_v8 = vmul.f32 %v406_v28, %v1150_v3  ;;  %v389_v3 = vadd.f32 %v388_v2, %v383_v6 }
  0xef   : > { %v414_v19 = vadd.f32 %v413_v7, %v408_v8 }
  0xf0   : > { %v292_v29 = vpop.permute.xlu1 %291  ;;  %v267_v30 = vpop.permute.xlu0 %266 }
  0xf1   : > { %v269_v38 = vmul.f32 %v1156_v5, %v267_v30  ;;  %v294_v43 = vmul.f32 %v1156_v5, %v292_v29 }
  0xf3   : > { %v270_v47 = vadd.f32 %v269_v38, %v264_v40  ;;  %v295_v56 = vadd.f32 %v294_v43, %v289_v46 }
  0xf4   : > { %v342_v31 = vpop.permute.xlu1 %341  ;;  %v317_v32 = vpop.permute.xlu0 %316 }
  0xf5   : > { %v319_v48 = vmul.f32 %v1156_v5, %v317_v32  ;;  %v344_v57 = vmul.f32 %v1156_v5, %v342_v31 }
  0xf7   : > { %v320_v60 = vadd.f32 %v319_v48, %v314_v54  ;;  %v345_v12 = vadd.f32 %v344_v57, %v339_v0 }
  0xf8   : > { %v392_v34 = vpop.permute.xlu1 %391  ;;  %v367_v35 = vpop.permute.xlu0 %366 }
  0xf9   : > { %v369_v61 = vmul.f32 %v1156_v5, %v367_v35  ;;  %v394_v13 = vmul.f32 %v1156_v5, %v392_v34 }
  0xfb   : > { %v370_v16 = vadd.f32 %v369_v61, %v364_v1 }
  0xfc   : > { %v273_v44 = vpop.permute.xlu1 %272  ;;  %v417_v45 = vpop.permute.xlu0 %416 }
  0xfd   : > { %v275_v49 = vmul.f32 %v1163_v10, %v273_v44  ;;  %v419_v17 = vmul.f32 %v1156_v5, %v417_v45  ;;  %v395_v5 = vadd.f32 %v394_v13, %v389_v3 }
  0xff   : > { %v276_v55 = vadd.f32 %v275_v49, %v270_v47  ;;  %v420_v24 = vadd.f32 %v419_v17, %v414_v19 }
 0x100   : > { %v323_v58 = vpop.permute.xlu1 %322  ;;  %v298_v59 = vpop.permute.xlu0 %297 }
 0x101   : > { %591 = vst [vmem:[%s1171_s0 + $0x8] sm:$0xff] %v276_v55  ;;  %v325_v62 = vmul.f32 %v1163_v10, %v323_v58  ;;  %v300_v63 = vmul.f32 %v1163_v10, %v298_v59 }
 0x103   : > { %v326_v9 = vadd.f32 %v325_v62, %v320_v60  ;;  %v301_v11 = vadd.f32 %v300_v63, %v295_v56 }
 0x104   : > { %v373_v14 = vpop.permute.xlu1 %372  ;;  %v348_v15 = vpop.permute.xlu0 %347 }
 0x105   : > { %605 = vst [vmem:[%s1171_s0 + $0x18] sm:$0xff] %v326_v9  ;;  %598 = vst [vmem:[%s1171_s0 + $0x10] sm:$0xff] %v301_v11  ;;  %v375_v18 = vmul.f32 %v1163_v10, %v373_v14  ;;  %v350_v4 = vmul.f32 %v1163_v10, %v348_v15 }
 0x107   : > { %v376_v20 = vadd.f32 %v375_v18, %v370_v16  ;;  %v351_v21 = vadd.f32 %v350_v4, %v345_v12 }
 0x108   : > { %v423_v22 = vpop.permute.xlu1 %422  ;;  %v398_v23 = vpop.permute.xlu0 %397 }
 0x109   : > { %619 = vst [vmem:[%s1171_s0 + $0x28] sm:$0xff] %v376_v20  ;;  %612 = vst [vmem:[%s1171_s0 + $0x20] sm:$0xff] %v351_v21  ;;  %v425_v25 = vmul.f32 %v1163_v10, %v423_v22  ;;  %v400_v26 = vmul.f32 %v1163_v10, %v398_v23 }
 0x10b   : > { %v426_v27 = vadd.f32 %v425_v25, %v420_v24  ;;  %v401_v28 = vadd.f32 %v400_v26, %v395_v5 }
 0x10d   : > { %633 = vst [vmem:[%s1171_s0 + $0x38] sm:$0xff] %v426_v27  ;;  %626 = vst [vmem:[%s1171_s0 + $0x30] sm:$0xff] %v401_v28 }
 0x10e   : > { %808 = shalt.err (!%p805_p12)
}
 0x10f   : > { %s809_s18 = scalar_lea.hbm %s1225_s23, 1024  ;;  %s813_s17 = scalar_lea.hbm %s1283_s2, 4096 }
 0x110   : > { %p810_p10 = scmp.ne.s32.totalorder %s1225_s23, %s809_s18  ;;  %p814_p4 = scmp.lt.u32.totalorder %s1225_s23, %s1283_s2 }
 0x111   : > { %p815_p3 = scmp.lt.u32.totalorder %s813_s17, %s809_s18  ;;  %p817_p0 = scmp.lt.u32.totalorder %s809_s18, %s1225_s23 }
 0x112   : > { %p811_p11 = pnand %p810_p10, %p1301_p2 }
 0x113   : > { %p816_p8 = por %p815_p3, %p814_p4 }
 0x114   : > { %p812_p1 = pneg %p811_p11 }
 0x115   : > { %p818_p5 = por %p817_p0, %p816_p8 }
 0x117   : > { %p819_p13 = pnand %p818_p5, %p812_p1 }
 0x119   : > { %822 = shalt.err (!%p819_p13)
}
 0x11a   : > { %s912_s0 = smov 128   ;;  %s913_s20 = smov 256  }
 0x11b   : > { %s914_s13 = smov 8  }
 0x11c   : > { %643 = dma.vmem_to_hbm [thread:$0]  (%p1301_p2), %s1216_s5, 1024, %s1225_s23, %s430_s21, %s912_s0, %s913_s20, %s914_s13  }
 0x11d PF: > { %p657_p6 = scmp.ge.s32.totalorder %s897_s16, 2  ;;  %s462_s12 = sand.u32 1, %s869_s9  }
 0x11e   : > { %p1302_p7 = scmp.ne.s32.totalorder %s1295_s28, 0  ;;  %s463_s26 = scalar_lea.sflag [#allocation4], %s462_s12 }
 0x120   : > { %p653_p9 = pnand %p657_p6, %p1302_p7 }
 0x122   : > { %864 = dma.done.wait (!%p653_p9), %s463_s26, 1024  }
 0x123   : > { %866 = vsyncadd (!%p653_p9), %s463_s26, 4294966272  ;;  %s21_s16 = sadd.s32 1, %s897_s16   ;;  %s1303_s25 = sld [smem:[#allocation11_spill]] }
 0x124   : > { %p18_p12 = scmp.ge.s32.totalorder %s21_s16, 6   ;;  %s1304_s22 = sld [smem:[#allocation12_spill]] }
 0x125   : > { %s1305_s9 = smov %s873_s10  ;;  %s1306_s10 = smov %s877_s11 }
 0x126   : > { %s1307_s11 = smov %s1010_s30  ;;  %s1308_s12 = smov %s889_s14 }
 0x127   : > { %s1309_s13 = smov %s893_s15  ;;  %20 = sbr.rel (!%p18_p12) target bundleno = 11 (0xb), region = 99 }
 0x129   : > { %s1310_s14 = smov %s1303_s25 }
 0x12a   : > { %s1311_s15 = smov %s1304_s22 }
 0x12e   :  { %468 = vsyncpa [#allocation3], 1 }
 0x12f   :  { %470 = vsyncpa [#allocation3 + $0x1], 1 }
 0x130   :  { %471 = vsyncpa [#allocation6], 1 }
 0x131   :  { %473 = vsyncpa [#allocation6 + $0x1], 1 }
 0x132   :  { %474 = vsyncpa [#allocation4], 1 }
 0x133   :  { %476 = vsyncpa [#allocation4 + $0x1], 1 }

</bundles_post_ra>
